<compile_context>
chip_gen: v5e
topology: v5e:2x2
jax: 0.10.0
libtpu: 0.0.40
codegen_flags: <defaults>
</compile_context>

<pallas_src>
import functools

import jax
import jax.numpy as jnp
from jax.experimental import pallas as pl
from jax.experimental.pallas import tpu as pltpu

BN_EPS = 1e-5
LANE = 128


def _round_up(x, m):
    return (x + m - 1) // m * m


# ---------------------------------------------------------------------------
# Kernel
# ---------------------------------------------------------------------------
def hash_net_kernel(xy_ref, w_ref, v_ref, o_ref, *, d_pad, l_pad):
    """Fused Hash_Net forward.

    xy_ref : (B, d_pad)  f32          concat([x, y]) zero-padded to d_pad lanes
    w_ref  : (d_pad + 2*l_pad, l_pad) packed weights (f32 or bf16):
               rows [0, d_pad)              W1 = blockdiag(iw1, tw1)
               rows [d_pad, d_pad+l_pad)    W2 = blockdiag(iw2, tw2)
               rows [d_pad+l_pad, +2*l_pad) W3 = vstack(hw, hw)  (fusion folded)
    v_ref  : (16, l_pad) f32          rows 0..8 = (bias, gamma, beta) x 3 layers
    o_ref  : (B, l_pad)  f32          tanh(hash); padded lanes are exactly 0
    """
    x = xy_ref[...].astype(jnp.float32)

    w1 = w_ref[0:d_pad, :]
    w2 = w_ref[d_pad:d_pad + l_pad, :]
    w3 = w_ref[d_pad + l_pad:d_pad + 2 * l_pad, :]

    def linear_bn(h, w, row0):
        b = v_ref[row0 + 0:row0 + 1, :]
        g = v_ref[row0 + 1:row0 + 2, :]
        bt = v_ref[row0 + 2:row0 + 3, :]
        # bf16 (v6e/v7x) or f32 matmul inputs, f32 accumulation either way.
        z = jnp.dot(h.astype(w.dtype), w,
                    preferred_element_type=jnp.float32) + b
        # Batch-statistics BN (training mode), one pass over z.
        mean = jnp.mean(z, axis=0, keepdims=True)
        var = jnp.mean(z * z, axis=0, keepdims=True) - mean * mean
        return (z - mean) * jax.lax.rsqrt(var + BN_EPS) * g + bt

    h1 = jnp.maximum(linear_bn(x, w1, 0), 0.0)    # image+text layer 1 (fused)
    h2 = jnp.maximum(linear_bn(h1, w2, 3), 0.0)   # image+text layer 2 = [imgH|txtH]
    code = jnp.tanh(linear_bn(h2, w3, 6))         # hash head (fusion add folded in)

    o_ref[...] = code.astype(o_ref.dtype)


# ---------------------------------------------------------------------------
# Host-side parameter packing
# ---------------------------------------------------------------------------
def pack_params(params, img_hidden_dim, txt_hidden_dim, bit,
                matmul_dtype=jnp.float32):
    """Pack 20 per-layer arrays into one weight buffer + one BN-vector buffer."""
    (iw1, ib1, ig1, ibt1, iw2, ib2, ig2, ibt2,
     tw1, tb1, tg1, tbt1, tw2, tb2, tg2, tbt2,
     hw, hb, hg, hbt) = params

    i0, i1, i2 = img_hidden_dim
    t0, t1, t2 = txt_hidden_dim
    d_in = i0 + t0
    h1 = i1 + t1
    h2 = i2 + t2
    d_pad = _round_up(d_in, LANE)
    l_pad = _round_up(max(h1, h2, bit), LANE)

    # W1 = blockdiag(iw1, tw1), padded to (d_pad, l_pad).
    w1 = jnp.zeros((d_pad, l_pad), jnp.float32)
    w1 = w1.at[:i0, :i1].set(iw1)
    w1 = w1.at[i0:d_in, i1:h1].set(tw1)

    # W2 = blockdiag(iw2, tw2), padded to (l_pad, l_pad).
    w2 = jnp.zeros((l_pad, l_pad), jnp.float32)
    w2 = w2.at[:i1, :i2].set(iw2)
    w2 = w2.at[i1:h1, i2:h2].set(tw2)

    # W3 = vstack(hw, hw): concat(imageH, textH) @ W3 == (imageH + textH) @ hw.
    w3 = jnp.zeros((l_pad, l_pad), jnp.float32)
    w3 = w3.at[:i2, :bit].set(hw)
    w3 = w3.at[i2:h2, :bit].set(hw)

    wbuf = jnp.concatenate([w1, w2, w3], axis=0).astype(matmul_dtype)

    def rows(b, g, bt, width):
        rb = jnp.zeros((1, l_pad), jnp.float32).at[:, :width].set(b.reshape(1, -1))
        rg = jnp.ones((1, l_pad), jnp.float32).at[:, :width].set(g.reshape(1, -1))
        rbt = jnp.zeros((1, l_pad), jnp.float32).at[:, :width].set(bt.reshape(1, -1))
        return [rb, rg, rbt]

    vrows = (
        rows(jnp.concatenate([ib1.reshape(-1), tb1.reshape(-1)]),
             jnp.concatenate([ig1.reshape(-1), tg1.reshape(-1)]),
             jnp.concatenate([ibt1.reshape(-1), tbt1.reshape(-1)]), h1)
        + rows(jnp.concatenate([ib2.reshape(-1), tb2.reshape(-1)]),
               jnp.concatenate([ig2.reshape(-1), tg2.reshape(-1)]),
               jnp.concatenate([ibt2.reshape(-1), tbt2.reshape(-1)]), h2)
        + rows(hb, hg, hbt, bit)
    )
    vbuf = jnp.concatenate(
        vrows + [jnp.zeros((16 - len(vrows), l_pad), jnp.float32)], axis=0)

    layout = dict(d_pad=d_pad, l_pad=l_pad, d_in=d_in)
    return wbuf, vbuf, layout


# ---------------------------------------------------------------------------
# Wrapper
# ---------------------------------------------------------------------------
def make_hash_net_forward(layout, bit):
    d_pad, l_pad, d_in = layout["d_pad"], layout["l_pad"], layout["d_in"]
    kernel = functools.partial(hash_net_kernel, d_pad=d_pad, l_pad=l_pad)
    vmem_spec = pl.BlockSpec(memory_space=pltpu.MemorySpace.VMEM)

    # TODO(synk): for large batches / feature dims, switch to a batch-gridded
    # two-pass BN (accumulate per-feature sum/sumsq over an 'arbitrary' batch
    # axis marked alongside a 'parallel' split for v7x's 2 TCs) instead of
    # keeping the whole batch resident in VMEM.
    @jax.jit
    def forward(x, y, wbuf, vbuf):
        batch = x.shape[0]
        xy = jnp.concatenate([x.astype(jnp.float32),
                              y.astype(jnp.float32)], axis=-1)
        if d_in < d_pad:
            xy = jnp.pad(xy, ((0, 0), (0, d_pad - d_in)))
        out = pl.pallas_call(
            kernel,
            out_shape=jax.ShapeDtypeStruct((batch, l_pad), jnp.float32),
            in_specs=[vmem_spec, vmem_spec, vmem_spec],
            out_specs=vmem_spec,
            compiler_params=pltpu.CompilerParams(
                vmem_limit_bytes=32 * 1024 * 1024),
        )(xy, wbuf, vbuf)
        return out[:, :bit]   # strip lane padding outside the kernel

    return forward


# ---------------------------------------------------------------------------
# Parameter construction + pure-JAX reference (PyTorch-equivalent semantics)
# ---------------------------------------------------------------------------
def make_params(key, img_hidden_dim, txt_hidden_dim, bit, num_classes):
    """Deterministic synthetic parameters (PyTorch Linear-like init scale)."""
    params = []

    def linear_bn_params(key, din, dout):
        kw, kb = jax.random.split(key)
        lim = 1.0 / jnp.sqrt(jnp.float32(din))
        w = jax.random.uniform(kw, (din, dout), jnp.float32, -lim, lim)  # (in, out)
        b = jax.random.uniform(kb, (1, dout), jnp.float32, -lim, lim)
        gamma = jnp.ones((1, dout), jnp.float32)
        beta = jnp.zeros((1, dout), jnp.float32)
        return [w, b, gamma, beta]

    keys = jax.random.split(key, 8)
    params += linear_bn_params(keys[0], img_hidden_dim[0], img_hidden_dim[1])
    params += linear_bn_params(keys[1], img_hidden_dim[1], img_hidden_dim[2])
    params += linear_bn_params(keys[2], txt_hidden_dim[0], txt_hidden_dim[1])
    params += linear_bn_params(keys[3], txt_hidden_dim[1], txt_hidden_dim[2])
    params += linear_bn_params(keys[4], img_hidden_dim[-1], bit)
    # centroids: module parameter unused in forward (kept for parity).
    centroids = jax.random.normal(keys[5], (num_classes, bit), jnp.float32)
    return params, centroids


def reference_forward(x, y, params):
    """Pure-JAX reference mirroring the PyTorch module (training-mode BN)."""
    def lin_bn(h, w, b, g, bt):
        z = h @ w + b
        mean = z.mean(0, keepdims=True)
        var = ((z - mean) ** 2).mean(0, keepdims=True)
        return ((z - mean) / jnp.sqrt(var + BN_EPS)) * g + bt

    p = params
    h = jax.nn.relu(lin_bn(x.astype(jnp.float32), *p[0:4]))
    image_h = jax.nn.relu(lin_bn(h, *p[4:8]))
    h = jax.nn.relu(lin_bn(y.astype(jnp.float32), *p[8:12]))
    text_h = jax.nn.relu(lin_bn(h, *p[12:16]))
    return jnp.tanh(lin_bn(image_h + text_h, *p[16:20]))


# ---------------------------------------------------------------------------
# Main
# ---------------------------------------------------------------------------
if __name__ == "__main__":
    # Small shapes consistent with the module:
    #   image_hidden_dim = [32, 64, 16], txt_hidden_dim = [24, 64, 16]
    #   (both MLPs end at fusion_dim = 16), bit = 8, num_classes = 10, batch = 8.
    img_hidden_dim = [32, 64, 16]
    txt_hidden_dim = [24, 64, 16]
    bit = 8
    num_classes = 10
    batch = 8

    key = jax.random.PRNGKey(0)
    kx, ky, kp = jax.random.split(key, 3)
    x = jax.random.normal(kx, (batch, img_hidden_dim[0]), jnp.float32)
    y = jax.random.normal(ky, (batch, txt_hidden_dim[0]), jnp.float32)

    params, _centroids = make_params(kp, img_hidden_dim, txt_hidden_dim, bit,
                                     num_classes)
    ref = reference_forward(x, y, params)

    # f32 matmul path (tight check).
    wbuf, vbuf, layout = pack_params(params, img_hidden_dim, txt_hidden_dim,
                                     bit, matmul_dtype=jnp.float32)
    forward = make_hash_net_forward(layout, bit)
    out = jax.block_until_ready(forward(x, y, wbuf, vbuf))
    assert out.shape == (batch, bit)
    assert jnp.allclose(out, ref, atol=1e-4, rtol=1e-4), "f32 mismatch vs reference"

    # bf16 matmul-input path (v6e/v7x suggestion); relaxed tolerance vs f32 ref.
    wbuf_bf16, vbuf_bf16, _ = pack_params(params, img_hidden_dim, txt_hidden_dim,
                                          bit, matmul_dtype=jnp.bfloat16)
    out_bf16 = jax.block_until_ready(forward(x, y, wbuf_bf16, vbuf_bf16))
    assert out_bf16.shape == (batch, bit)
    assert float(jnp.max(jnp.abs(out_bf16 - ref))) < 0.1, "bf16 mismatch vs reference"

    print("KERNEL_OK")
</pallas_src>

<mosaic_0001>
module attributes {stable_mosaic.version = 11 : i64} {
  func.func @hash_net_kernel(%arg0: memref<8x128xf32, #tpu.memory_space<vmem>>, %arg1: memref<384x128xf32, #tpu.memory_space<vmem>>, %arg2: memref<16x128xf32, #tpu.memory_space<vmem>>, %arg3: memref<8x128xf32, #tpu.memory_space<vmem>>) attributes {dimension_semantics = [], scalar_prefetch = 0 : i64, scratch_operands = 0 : i64, tpu.core_type = #tpu.core_type<tc>} {
    %c0 = arith.constant 0 : index
    %c0_0 = arith.constant 0 : index
    %0 = vector.load %arg0[%c0, %c0_0] : memref<8x128xf32, #tpu.memory_space<vmem>>, vector<8x128xf32>
    %c0_1 = arith.constant 0 : index
    %c0_2 = arith.constant 0 : index
    %1 = vector.load %arg1[%c0_1, %c0_2] : memref<384x128xf32, #tpu.memory_space<vmem>>, vector<128x128xf32>
    %c128 = arith.constant 128 : index
    %c0_3 = arith.constant 0 : index
    %2 = vector.load %arg1[%c128, %c0_3] : memref<384x128xf32, #tpu.memory_space<vmem>>, vector<128x128xf32>
    %c256 = arith.constant 256 : index
    %c0_4 = arith.constant 0 : index
    %3 = vector.load %arg1[%c256, %c0_4] : memref<384x128xf32, #tpu.memory_space<vmem>>, vector<128x128xf32>
    %c0_5 = arith.constant 0 : index
    %c0_6 = arith.constant 0 : index
    %4 = vector.load %arg2[%c0_5, %c0_6] : memref<16x128xf32, #tpu.memory_space<vmem>>, vector<1x128xf32>
    %c1 = arith.constant 1 : index
    %c0_7 = arith.constant 0 : index
    %5 = vector.load %arg2[%c1, %c0_7] : memref<16x128xf32, #tpu.memory_space<vmem>>, vector<1x128xf32>
    %c2 = arith.constant 2 : index
    %c0_8 = arith.constant 0 : index
    %6 = vector.load %arg2[%c2, %c0_8] : memref<16x128xf32, #tpu.memory_space<vmem>>, vector<1x128xf32>
    %cst = arith.constant dense<0.000000e+00> : vector<8x128xf32>
    %7 = tpu.matmul %0, %1, %cst {dimension_numbers = #tpu.dot_dimension_numbers<[1], [0], [0], [1], [0, 0, 1, 1], [], []>} : vector<8x128xf32>, vector<128x128xf32>, vector<8x128xf32> -> vector<8x128xf32>
    %8 = vector.broadcast %4 : vector<1x128xf32> to vector<8x128xf32>
    %9 = arith.addf %7, %8 : vector<8x128xf32>
    %cst_9 = arith.constant dense<0.000000e+00> : vector<128xf32>
    %10 = vector.multi_reduction <add>, %9, %cst_9 [0] : vector<8x128xf32> to vector<128xf32>
    %11 = vector.shape_cast %10 : vector<128xf32> to vector<1x128xf32>
    %cst_10 = arith.constant 8.000000e+00 : f32
    %12 = vector.broadcast %cst_10 : f32 to vector<1x128xf32>
    %13 = arith.divf %11, %12 : vector<1x128xf32>
    %14 = arith.mulf %9, %9 : vector<8x128xf32>
    %cst_11 = arith.constant dense<0.000000e+00> : vector<128xf32>
    %15 = vector.multi_reduction <add>, %14, %cst_11 [0] : vector<8x128xf32> to vector<128xf32>
    %16 = vector.shape_cast %15 : vector<128xf32> to vector<1x128xf32>
    %cst_12 = arith.constant 8.000000e+00 : f32
    %17 = vector.broadcast %cst_12 : f32 to vector<1x128xf32>
    %18 = arith.divf %16, %17 : vector<1x128xf32>
    %19 = arith.mulf %13, %13 : vector<1x128xf32>
    %20 = arith.subf %18, %19 : vector<1x128xf32>
    %21 = vector.broadcast %13 : vector<1x128xf32> to vector<8x128xf32>
    %22 = arith.subf %9, %21 : vector<8x128xf32>
    %cst_13 = arith.constant 9.99999974E-6 : f32
    %23 = vector.broadcast %cst_13 : f32 to vector<1x128xf32>
    %24 = arith.addf %20, %23 : vector<1x128xf32>
    %25 = math.rsqrt %24 : vector<1x128xf32>
    %26 = vector.broadcast %25 : vector<1x128xf32> to vector<8x128xf32>
    %27 = arith.mulf %22, %26 : vector<8x128xf32>
    %28 = vector.broadcast %5 : vector<1x128xf32> to vector<8x128xf32>
    %29 = arith.mulf %27, %28 : vector<8x128xf32>
    %30 = vector.broadcast %6 : vector<1x128xf32> to vector<8x128xf32>
    %31 = arith.addf %29, %30 : vector<8x128xf32>
    %cst_14 = arith.constant 0.000000e+00 : f32
    %32 = vector.broadcast %cst_14 : f32 to vector<8x128xf32>
    %33 = arith.maximumf %31, %32 : vector<8x128xf32>
    %c3 = arith.constant 3 : index
    %c0_15 = arith.constant 0 : index
    %34 = vector.load %arg2[%c3, %c0_15] : memref<16x128xf32, #tpu.memory_space<vmem>>, vector<1x128xf32>
    %c4 = arith.constant 4 : index
    %c0_16 = arith.constant 0 : index
    %35 = vector.load %arg2[%c4, %c0_16] : memref<16x128xf32, #tpu.memory_space<vmem>>, vector<1x128xf32>
    %c5 = arith.constant 5 : index
    %c0_17 = arith.constant 0 : index
    %36 = vector.load %arg2[%c5, %c0_17] : memref<16x128xf32, #tpu.memory_space<vmem>>, vector<1x128xf32>
    %cst_18 = arith.constant dense<0.000000e+00> : vector<8x128xf32>
    %37 = tpu.matmul %33, %2, %cst_18 {dimension_numbers = #tpu.dot_dimension_numbers<[1], [0], [0], [1], [0, 0, 1, 1], [], []>} : vector<8x128xf32>, vector<128x128xf32>, vector<8x128xf32> -> vector<8x128xf32>
    %38 = vector.broadcast %34 : vector<1x128xf32> to vector<8x128xf32>
    %39 = arith.addf %37, %38 : vector<8x128xf32>
    %cst_19 = arith.constant dense<0.000000e+00> : vector<128xf32>
    %40 = vector.multi_reduction <add>, %39, %cst_19 [0] : vector<8x128xf32> to vector<128xf32>
    %41 = vector.shape_cast %40 : vector<128xf32> to vector<1x128xf32>
    %cst_20 = arith.constant 8.000000e+00 : f32
    %42 = vector.broadcast %cst_20 : f32 to vector<1x128xf32>
    %43 = arith.divf %41, %42 : vector<1x128xf32>
    %44 = arith.mulf %39, %39 : vector<8x128xf32>
    %cst_21 = arith.constant dense<0.000000e+00> : vector<128xf32>
    %45 = vector.multi_reduction <add>, %44, %cst_21 [0] : vector<8x128xf32> to vector<128xf32>
    %46 = vector.shape_cast %45 : vector<128xf32> to vector<1x128xf32>
    %cst_22 = arith.constant 8.000000e+00 : f32
    %47 = vector.broadcast %cst_22 : f32 to vector<1x128xf32>
    %48 = arith.divf %46, %47 : vector<1x128xf32>
    %49 = arith.mulf %43, %43 : vector<1x128xf32>
    %50 = arith.subf %48, %49 : vector<1x128xf32>
    %51 = vector.broadcast %43 : vector<1x128xf32> to vector<8x128xf32>
    %52 = arith.subf %39, %51 : vector<8x128xf32>
    %cst_23 = arith.constant 9.99999974E-6 : f32
    %53 = vector.broadcast %cst_23 : f32 to vector<1x128xf32>
    %54 = arith.addf %50, %53 : vector<1x128xf32>
    %55 = math.rsqrt %54 : vector<1x128xf32>
    %56 = vector.broadcast %55 : vector<1x128xf32> to vector<8x128xf32>
    %57 = arith.mulf %52, %56 : vector<8x128xf32>
    %58 = vector.broadcast %35 : vector<1x128xf32> to vector<8x128xf32>
    %59 = arith.mulf %57, %58 : vector<8x128xf32>
    %60 = vector.broadcast %36 : vector<1x128xf32> to vector<8x128xf32>
    %61 = arith.addf %59, %60 : vector<8x128xf32>
    %cst_24 = arith.constant 0.000000e+00 : f32
    %62 = vector.broadcast %cst_24 : f32 to vector<8x128xf32>
    %63 = arith.maximumf %61, %62 : vector<8x128xf32>
    %c6 = arith.constant 6 : index
    %c0_25 = arith.constant 0 : index
    %64 = vector.load %arg2[%c6, %c0_25] : memref<16x128xf32, #tpu.memory_space<vmem>>, vector<1x128xf32>
    %c7 = arith.constant 7 : index
    %c0_26 = arith.constant 0 : index
    %65 = vector.load %arg2[%c7, %c0_26] : memref<16x128xf32, #tpu.memory_space<vmem>>, vector<1x128xf32>
    %c8 = arith.constant 8 : index
    %c0_27 = arith.constant 0 : index
    %66 = vector.load %arg2[%c8, %c0_27] : memref<16x128xf32, #tpu.memory_space<vmem>>, vector<1x128xf32>
    %cst_28 = arith.constant dense<0.000000e+00> : vector<8x128xf32>
    %67 = tpu.matmul %63, %3, %cst_28 {dimension_numbers = #tpu.dot_dimension_numbers<[1], [0], [0], [1], [0, 0, 1, 1], [], []>} : vector<8x128xf32>, vector<128x128xf32>, vector<8x128xf32> -> vector<8x128xf32>
    %68 = vector.broadcast %64 : vector<1x128xf32> to vector<8x128xf32>
    %69 = arith.addf %67, %68 : vector<8x128xf32>
    %cst_29 = arith.constant dense<0.000000e+00> : vector<128xf32>
    %70 = vector.multi_reduction <add>, %69, %cst_29 [0] : vector<8x128xf32> to vector<128xf32>
    %71 = vector.shape_cast %70 : vector<128xf32> to vector<1x128xf32>
    %cst_30 = arith.constant 8.000000e+00 : f32
    %72 = vector.broadcast %cst_30 : f32 to vector<1x128xf32>
    %73 = arith.divf %71, %72 : vector<1x128xf32>
    %74 = arith.mulf %69, %69 : vector<8x128xf32>
    %cst_31 = arith.constant dense<0.000000e+00> : vector<128xf32>
    %75 = vector.multi_reduction <add>, %74, %cst_31 [0] : vector<8x128xf32> to vector<128xf32>
    %76 = vector.shape_cast %75 : vector<128xf32> to vector<1x128xf32>
    %cst_32 = arith.constant 8.000000e+00 : f32
    %77 = vector.broadcast %cst_32 : f32 to vector<1x128xf32>
    %78 = arith.divf %76, %77 : vector<1x128xf32>
    %79 = arith.mulf %73, %73 : vector<1x128xf32>
    %80 = arith.subf %78, %79 : vector<1x128xf32>
    %81 = vector.broadcast %73 : vector<1x128xf32> to vector<8x128xf32>
    %82 = arith.subf %69, %81 : vector<8x128xf32>
    %cst_33 = arith.constant 9.99999974E-6 : f32
    %83 = vector.broadcast %cst_33 : f32 to vector<1x128xf32>
    %84 = arith.addf %80, %83 : vector<1x128xf32>
    %85 = math.rsqrt %84 : vector<1x128xf32>
    %86 = vector.broadcast %85 : vector<1x128xf32> to vector<8x128xf32>
    %87 = arith.mulf %82, %86 : vector<8x128xf32>
    %88 = vector.broadcast %65 : vector<1x128xf32> to vector<8x128xf32>
    %89 = arith.mulf %87, %88 : vector<8x128xf32>
    %90 = vector.broadcast %66 : vector<1x128xf32> to vector<8x128xf32>
    %91 = arith.addf %89, %90 : vector<8x128xf32>
    %92 = math.tanh %91 : vector<8x128xf32>
    %c0_34 = arith.constant 0 : index
    %c0_35 = arith.constant 0 : index
    %93 = vector.load %arg3[%c0_34, %c0_35] : memref<8x128xf32, #tpu.memory_space<vmem>>, vector<8x128xf32>
    tpu.vector_store %arg3[%c0_34, %c0_35], %92 {strides = array<i32>} : memref<8x128xf32, #tpu.memory_space<vmem>>, vector<8x128xf32>,
    return
  }
}

</mosaic_0001>

<bundles_post_ra>
// kernel: forward.1
= control target key start
LH: loop header
LB: loop body
LE: loop exit
PB: predicated region body
PF: predicated region fallthrough
CT: control target
= control target key end

     0   :  { %8 = vsyncpa [#allocation3], 0  ;;  %s427_s0 = inlined_call_operand.vmem [shape: f32[8,128], index: 0, kind: input, shape index: {}]   ;;  %s428_s1 = inlined_call_operand.hbm [shape: f32[384,128], index: 1, kind: input, shape index: {}]   ;;  %s429_s2 = inlined_call_operand.vmem [shape: f32[16,128], index: 2, kind: input, shape index: {}]   ;;  %s430_s3 = inlined_call_operand.hbm [shape: f32[8,128], index: 3, kind: output, shape index: {}]  }
   0x1   :  { %9 = vsyncpa [#allocation4], 0  ;;  %s16_s14 = sshll.u32 %s428_s1, 4  ;;  %s358_s15 = smov [#allocation2]   ;;  %s17_s14 = int_to_ptr.hbm [resolvable:$true] %s16_s14 }
   0x2   :  { %s18_s16 = sshll.u32 %s358_s15, 4  ;;  %s359_s17 = smov 128   ;;  %s19_s16 = int_to_ptr.vmem [resolvable:$true] %s18_s16 }
   0x3   :  { %s360_s18 = smov 8  }
   0x4   :  { %24 = dma.hbm_to_vmem [thread:$0]  %s17_s14, 6144, %s19_s16, [#allocation3], %s359_s17, %s359_s17, %s360_s18  }
   0x5   :  { %354 = dma.done.wait [#allocation3], 6144  }
   0x6   :  { %355 = vsyncadd [#allocation3], 4294961152  ;;  %v47_v0 = vld [vmem:[#allocation2 + $0x78] sm:$0xff]  ;;  %v46_v1 = vld [vmem:[#allocation2 + $0x70] sm:$0xff]  ;;  %v361_v21 = vmov 8.0   ;;  %s362_s10 = smov [#allocation5]  }
   0x7   :  { %84 = vmatpush.msra.mxu0 %v47_v0  ;;  %v45_v2 = vld [vmem:[#allocation2 + $0x68] sm:$0xff]  ;;  %v44_v3 = vld [vmem:[#allocation2 + $0x60] sm:$0xff]  ;;  %v43_v4 = vld [vmem:[#allocation2 + $0x58] sm:$0xff]  ;;  %296 = vrcp.f32 %v361_v21  ;;  %s270_s11 = sshll.u32 %s362_s10, 4  ;;  %s272_s14 = sshll.u32 %s430_s3, 4  ;;  %s271_s11 = int_to_ptr.vmem [resolvable:$true] %s270_s11  ;;  %s273_s14 = int_to_ptr.hbm [resolvable:$true] %s272_s14 }
   0x8   :  { %v42_v5 = vld [vmem:[#allocation2 + $0x50] sm:$0xff]  ;;  %v41_v6 = vld [vmem:[#allocation2 + $0x48] sm:$0xff]  ;;  %v40_v7 = vld [vmem:[#allocation2 + $0x40] sm:$0xff] }
   0x9   :  { %85 = vmatpush.msra.mxu0 %v46_v1  ;;  %v39_v8 = vld [vmem:[#allocation2 + $0x38] sm:$0xff]  ;;  %v38_v9 = vld [vmem:[#allocation2 + $0x30] sm:$0xff]  ;;  %v37_v10 = vld [vmem:[#allocation2 + $0x28] sm:$0xff] }
   0xa   :  { %v36_v11 = vld [vmem:[#allocation2 + $0x20] sm:$0xff]  ;;  %v35_v12 = vld [vmem:[#allocation2 + $0x18] sm:$0xff]  ;;  %v34_v13 = vld [vmem:[#allocation2 + $0x10] sm:$0xff] }
   0xb   :  { %86 = vmatpush.msra.mxu0 %v45_v2  ;;  %v33_v14 = vld [vmem:[#allocation2 + $0x8] sm:$0xff]  ;;  %v32_v15 = vld [vmem:[#allocation2] sm:$0xff]  ;;  %v63_v17 = vld [vmem:[#allocation2 + $0xf8] sm:$0xff] }
   0xc   :  { %v31_v16 = vld [vmem:[%s427_s0] sm:$0xff]  ;;  %v62_v18 = vld [vmem:[#allocation2 + $0xf0] sm:$0xff]  ;;  %150 = vmatpush.msra.mxu1 %v63_v17  ;;  %v61_v19 = vld [vmem:[#allocation2 + $0xe8] sm:$0xff] }
   0xd   :  { %87 = vmatpush.msra.mxu0 %v44_v3  ;;  %v60_v20 = vld [vmem:[#allocation2 + $0xe0] sm:$0xff]  ;;  %v59_v22 = vld [vmem:[#allocation2 + $0xd8] sm:$0xff]  ;;  %v58_v23 = vld [vmem:[#allocation2 + $0xd0] sm:$0xff]  ;;  %v297_v24 = vpop.eup %296 }
   0xe   :  { %151 = vmatpush.msra.mxu1 %v62_v18  ;;  %v57_v25 = vld [vmem:[#allocation2 + $0xc8] sm:$0xff]  ;;  %v56_v26 = vld [vmem:[#allocation2 + $0xc0] sm:$0xff]  ;;  %v111_v27 = vmul.f32 8.0, %v297_v24  ;;  %v55_v29 = vld [vmem:[#allocation2 + $0xb8] sm:$0xff]  ;;  %vm115_vm0 = vweird.f32 %v297_v24 }
   0xf   :  { %88 = vmatpush.msra.mxu0 %v43_v4  ;;  %v287_v28 = vld [vmem:[%s429_s2] ss:$0 sm:$0xff]  ;;  %v54_v30 = vld [vmem:[#allocation2 + $0xb0] sm:$0xff]  ;;  %v53_v34 = vld [vmem:[#allocation2 + $0xa8] sm:$0xff] }
  0x10   :  { %152 = vmatpush.msra.mxu1 %v61_v19  ;;  %v112_v32 = vsub.f32 1.0, %v111_v27  ;;  %v52_v37 = vld [vmem:[#allocation2 + $0xa0] sm:$0xff]  ;;  %v51_v41 = vld [vmem:[#allocation2 + $0x98] sm:$0xff]  ;;  %v50_v44 = vld [vmem:[#allocation2 + $0x90] sm:$0xff] }
  0x11   :  { %89 = vmatpush.msra.mxu0 %v42_v5  ;;  %v49_v48 = vld [vmem:[#allocation2 + $0x88] sm:$0xff]  ;;  %v48_v51 = vld [vmem:[#allocation2 + $0x80] sm:$0xff]  ;;  %v70_v21 = vld [vmem:[#allocation2 + $0x130] sm:$0xff] }
  0x12   :  { %153 = vmatpush.msra.mxu1 %v60_v20  ;;  %v113_v38 = vmul.f32 %v297_v24, %v112_v32  ;;  %v288_v4 = vld [vmem:[%s429_s2 + $0x1] ss:$0 sm:$0xff]  ;;  %v73_v17 = vld [vmem:[#allocation2 + $0x148] sm:$0xff]  ;;  %v290_v19 = vld [vmem:[%s429_s2 + $0x3] ss:$0 sm:$0xff] }
  0x13   :  { %90 = vmatpush.msra.mxu0 %v41_v6  ;;  %v72_v18 = vld [vmem:[#allocation2 + $0x140] sm:$0xff]  ;;  %v71_v20 = vld [vmem:[#allocation2 + $0x138] sm:$0xff] }
  0x14   :  { %154 = vmatpush.msra.mxu1 %v59_v22  ;;  %v114_v45 = vadd.f32 %v297_v24, %v113_v38  ;;  %v68_v27 = vld [vmem:[#allocation2 + $0x120] sm:$0xff] }
  0x15   :  { %91 = vmatpush.msra.mxu0 %v40_v7  ;;  %v289_v7 = vld [vmem:[%s429_s2 + $0x2] ss:$0 sm:$0xff] }
  0x16   :  { %155 = vmatpush.msra.mxu1 %v58_v23  ;;  %v392_v52 = vsel %vm115_vm0, %v297_v24, %v114_v45  ;;  %v69_v24 = vld [vmem:[#allocation2 + $0x128] sm:$0xff] }
  0x17   :  { %92 = vmatpush.msra.mxu0 %v39_v8 }
  0x18   :  { %156 = vmatpush.msra.mxu1 %v57_v25 }
  0x19   :  { %93 = vmatpush.msra.mxu0 %v38_v9 }
  0x1a   :  { %157 = vmatpush.msra.mxu1 %v56_v26 }
  0x1b   :  { %94 = vmatpush.msra.mxu0 %v37_v10 }
  0x1c   :  { %158 = vmatpush.msra.mxu1 %v55_v29 }
  0x1d   :  { %95 = vmatpush.msra.mxu0 %v36_v11  ;;  %v79_v11 = vld [vmem:[#allocation2 + $0x178] sm:$0xff] }
  0x1e   :  { %159 = vmatpush.msra.mxu1 %v54_v30  ;;  %209 = vmatpush.msra.mxu2 %v79_v11  ;;  %v67_v30 = vld [vmem:[#allocation2 + $0x118] sm:$0xff] }
  0x1f   :  { %96 = vmatpush.msra.mxu0 %v35_v12  ;;  %v78_v12 = vld [vmem:[#allocation2 + $0x170] sm:$0xff] }
  0x20   :  { %160 = vmatpush.msra.mxu1 %v53_v34  ;;  %210 = vmatpush.msra.mxu2 %v78_v12 }
  0x21   :  { %97 = vmatpush.msra.mxu0 %v34_v13  ;;  %v77_v13 = vld [vmem:[#allocation2 + $0x168] sm:$0xff] }
  0x22   :  { %161 = vmatpush.msra.mxu1 %v52_v37  ;;  %211 = vmatpush.msra.mxu2 %v77_v13 }
  0x23   :  { %98 = vmatpush.msra.mxu0 %v33_v14  ;;  %v76_v14 = vld [vmem:[#allocation2 + $0x160] sm:$0xff] }
  0x24   :  { %162 = vmatpush.msra.mxu1 %v51_v41  ;;  %212 = vmatpush.msra.mxu2 %v76_v14 }
  0x25   :  { %99 = vmatpush.msra.mxu0 %v32_v15  ;;  %v75_v15 = vld [vmem:[#allocation2 + $0x158] sm:$0xff] }
  0x26   :  { %100 = vmatmul.f32.vlgmr.msra.gmra.mxu0 %v31_v16  ;;  %163 = vmatpush.msra.mxu1 %v50_v44  ;;  %v74_v16 = vld [vmem:[#allocation2 + $0x150] sm:$0xff] }
  0x27   :  { %213 = vmatpush.msra.mxu2 %v75_v15 }
  0x28   :  { %164 = vmatpush.msra.mxu1 %v49_v48 }
  0x29   :  { %214 = vmatpush.msra.mxu2 %v74_v16 }
  0x2a   :  { %165 = vmatpush.msra.mxu1 %v48_v51 }
  0x2b   :  { %215 = vmatpush.msra.mxu2 %v73_v17 }
  0x2d   :  { %216 = vmatpush.msra.mxu2 %v72_v18 }
  0x2f   :  { %217 = vmatpush.msra.mxu2 %v71_v20 }
  0x31   :  { %218 = vmatpush.msra.mxu2 %v70_v21 }
  0x33   :  { %219 = vmatpush.msra.mxu2 %v69_v24 }
  0x35   :  { %220 = vmatpush.msra.mxu2 %v68_v27  ;;  %v294_v27 = vld [vmem:[%s429_s2 + $0x7] ss:$0 sm:$0xff] }
  0x37   :  { %221 = vmatpush.msra.mxu2 %v67_v30 }
  0xa3   :  { %v101_v31 = vpop.f32.mrf.mxu0 }
  0xa4   :  { %v102_v33 = vadd.f32 %v287_v28, %v101_v31 }
  0xa6   :  { %v104_v35 = vrot.slane %v102_v33, 4  ;;  %v118_v36 = vmul.f32 %v102_v33, %v102_v33 }
  0xa8   :  { %v105_v39 = vadd.f32 %v104_v35, %v102_v33  ;;  %v119_v40 = vrot.slane %v118_v36, 4 }
  0xaa   :  { %v106_v42 = vrot.slane %v105_v39, 2  ;;  %v120_v43 = vadd.f32 %v119_v40, %v118_v36  ;;  %v65_v36 = vld [vmem:[#allocation2 + $0x108] sm:$0xff] }
  0xac   :  { %v107_v46 = vadd.f32 %v106_v42, %v105_v39  ;;  %v121_v47 = vrot.slane %v120_v43, 2  ;;  %v64_v39 = vld [vmem:[#allocation2 + $0x100] sm:$0xff] }
  0xae   :  { %v108_v49 = vrot.slane %v107_v46, 1  ;;  %v122_v50 = vadd.f32 %v121_v47, %v120_v43 }
  0xb0   :  { %v123_v53 = vrot.slane %v122_v50, 1  ;;  %v109_v54 = vadd.f32 %v108_v49, %v107_v46 }
  0xb2   :  { %v124_v55 = vadd.f32 %v123_v53, %v122_v50  ;;  %v117_v56 = vmul.f32 %v392_v52, %v109_v54 }
  0xb4   :  { %v125_v57 = vmul.f32 %v124_v55, %v392_v52  ;;  %v126_v58 = vmul.f32 %v117_v56, %v117_v56  ;;  %v128_v3 = vsub.f32 %v102_v33, %v117_v56  ;;  %v66_v33 = vld [vmem:[#allocation2 + $0x110] sm:$0xff]  ;;  %v291_v56 = vld [vmem:[%s429_s2 + $0x4] ss:$0 sm:$0xff] }
  0xb5   :  { %222 = vmatpush.msra.mxu2 %v66_v33 }
  0xb6   :  { %v127_v59 = vsub.f32 %v125_v57, %v126_v58 }
  0xb7   :  { %223 = vmatpush.msra.mxu2 %v65_v36 }
  0xb8   :  { %v129_v60 = vadd.f32 1e-05, %v127_v59  ;;  %v292_v59 = vld [vmem:[%s429_s2 + $0x5] ss:$0 sm:$0xff] }
  0xb9   :  { %224 = vmatpush.msra.mxu2 %v64_v39 }
  0xba   :  { %298 = vrsqrt.f32 %v129_v60  ;;  %vm136_vm2 = vweird.f32 %v129_v60 }
  0xc0   :  { %v299_v61 = vpop.eup %298 }
  0xc1   :  { %v131_v62 = vmul.f32 %v299_v61, %v129_v60  ;;  %vm137_vm1 = vweird.f32 %v299_v61 }
  0xc2   :  { %vm138_vm3 = vmor %vm136_vm2, %vm137_vm1 }
  0xc3   :  { %v132_v63 = vmul.f32 %v299_v61, %v131_v62 }
  0xc5   :  { %v133_v0 = vmul.f32 0.5, %v132_v63  ;;  %v293_v63 = vld [vmem:[%s429_s2 + $0x6] ss:$0 sm:$0xff] }
  0xc7   :  { %v134_v1 = vsub.f32 1.5, %v133_v0 }
  0xc9   :  { %v135_v2 = vmul.f32 %v299_v61, %v134_v1 }
  0xcb   :  { %v139_v5 = vsel %vm138_vm3, %v299_v61, %v135_v2 }
  0xcc   :  { %v140_v6 = vmul.f32 %v139_v5, %v128_v3 }
  0xce   :  { %v142_v8 = vmul.f32 %v288_v4, %v140_v6 }
  0xd0   :  { %v144_v9 = vadd.f32 %v289_v7, %v142_v8 }
  0xd2   :  { %v145_v10 = vmax.f32 %v144_v9, 0.0 }
  0xd4   :  { %166 = vmatmul.f32.vlgmr.msra.gmra.mxu1 %v145_v10 }
 0x151   :  { %v167_v22 = vpop.f32.mrf.mxu1 }
 0x152   :  { %v168_v23 = vadd.f32 %v290_v19, %v167_v22 }
 0x154   :  { %v170_v25 = vrot.slane %v168_v23, 4  ;;  %v177_v26 = vmul.f32 %v168_v23, %v168_v23 }
 0x156   :  { %v171_v28 = vadd.f32 %v170_v25, %v168_v23  ;;  %v178_v29 = vrot.slane %v177_v26, 4 }
 0x158   :  { %v172_v31 = vrot.slane %v171_v28, 2  ;;  %v179_v32 = vadd.f32 %v178_v29, %v177_v26  ;;  %v295_v29 = vld [vmem:[%s429_s2 + $0x8] ss:$0 sm:$0xff] }
 0x15a   :  { %v173_v34 = vadd.f32 %v172_v31, %v171_v28  ;;  %v180_v35 = vrot.slane %v179_v32, 2 }
 0x15c   :  { %v174_v37 = vrot.slane %v173_v34, 1  ;;  %v181_v38 = vadd.f32 %v180_v35, %v179_v32 }
 0x15e   :  { %v182_v40 = vrot.slane %v181_v38, 1  ;;  %v175_v41 = vadd.f32 %v174_v37, %v173_v34 }
 0x160   :  { %v183_v42 = vadd.f32 %v182_v40, %v181_v38  ;;  %v176_v43 = vmul.f32 %v175_v41, %v392_v52 }
 0x162   :  { %v184_v44 = vmul.f32 %v183_v42, %v392_v52  ;;  %v185_v45 = vmul.f32 %v176_v43, %v176_v43  ;;  %v187_v55 = vsub.f32 %v168_v23, %v176_v43 }
 0x164   :  { %v186_v46 = vsub.f32 %v184_v44, %v185_v45 }
 0x166   :  { %v188_v47 = vadd.f32 1e-05, %v186_v46 }
 0x168   :  { %300 = vrsqrt.f32 %v188_v47  ;;  %vm195_vm5 = vweird.f32 %v188_v47 }
 0x16e   :  { %v301_v48 = vpop.eup %300 }
 0x16f   :  { %v190_v49 = vmul.f32 %v301_v48, %v188_v47  ;;  %vm196_vm4 = vweird.f32 %v301_v48 }
 0x170   :  { %vm197_vm6 = vmor %vm195_vm5, %vm196_vm4 }
 0x171   :  { %v191_v50 = vmul.f32 %v301_v48, %v190_v49 }
 0x173   :  { %v192_v51 = vmul.f32 0.5, %v191_v50 }
 0x175   :  { %v193_v53 = vsub.f32 1.5, %v192_v51 }
 0x177   :  { %v194_v54 = vmul.f32 %v301_v48, %v193_v53 }
 0x179   :  { %v198_v57 = vsel %vm197_vm6, %v301_v48, %v194_v54 }
 0x17a   :  { %v199_v58 = vmul.f32 %v198_v57, %v187_v55 }
 0x17c   :  { %v201_v60 = vmul.f32 %v291_v56, %v199_v58 }
 0x17e   :  { %v203_v61 = vadd.f32 %v292_v59, %v201_v60 }
 0x180   :  { %v204_v62 = vmax.f32 %v203_v61, 0.0 }
 0x182   :  { %225 = vmatmul.f32.vlgmr.msra.gmra.mxu2 %v204_v62 }
 0x205   :  { %v226_v0 = vpop.f32.mrf.mxu2 }
 0x206   :  { %v227_v1 = vadd.f32 %v293_v63, %v226_v0 }
 0x208   :  { %v229_v2 = vrot.slane %v227_v1, 4  ;;  %v236_v3 = vmul.f32 %v227_v1, %v227_v1 }
 0x20a   :  { %v230_v4 = vadd.f32 %v229_v2, %v227_v1  ;;  %v237_v5 = vrot.slane %v236_v3, 4 }
 0x20c   :  { %v231_v6 = vrot.slane %v230_v4, 2  ;;  %v238_v7 = vadd.f32 %v237_v5, %v236_v3 }
 0x20e   :  { %v232_v8 = vadd.f32 %v231_v6, %v230_v4  ;;  %v239_v9 = vrot.slane %v238_v7, 2 }
 0x210   :  { %v233_v10 = vrot.slane %v232_v8, 1  ;;  %v240_v11 = vadd.f32 %v239_v9, %v238_v7 }
 0x212   :  { %v234_v12 = vadd.f32 %v233_v10, %v232_v8  ;;  %v241_v13 = vrot.slane %v240_v11, 1 }
 0x214   :  { %v235_v14 = vmul.f32 %v234_v12, %v392_v52  ;;  %v242_v15 = vadd.f32 %v241_v13, %v240_v11 }
 0x216   :  { %v243_v16 = vmul.f32 %v242_v15, %v392_v52  ;;  %v244_v17 = vmul.f32 %v235_v14, %v235_v14  ;;  %v246_v26 = vsub.f32 %v227_v1, %v235_v14 }
 0x218   :  { %v245_v18 = vsub.f32 %v243_v16, %v244_v17 }
 0x21a   :  { %v247_v19 = vadd.f32 1e-05, %v245_v18 }
 0x21c   :  { %302 = vrsqrt.f32 %v247_v19  ;;  %vm254_vm8 = vweird.f32 %v247_v19 }
 0x222   :  { %v303_v20 = vpop.eup %302 }
 0x223   :  { %v249_v21 = vmul.f32 %v303_v20, %v247_v19  ;;  %vm255_vm7 = vweird.f32 %v303_v20 }
 0x224   :  { %vm256_vm9 = vmor %vm254_vm8, %vm255_vm7 }
 0x225   :  { %v250_v22 = vmul.f32 %v303_v20, %v249_v21 }
 0x227   :  { %v251_v23 = vmul.f32 0.5, %v250_v22 }
 0x229   :  { %v252_v24 = vsub.f32 1.5, %v251_v23 }
 0x22b   :  { %v253_v25 = vmul.f32 %v303_v20, %v252_v24 }
 0x22d   :  { %v257_v28 = vsel %vm256_vm9, %v303_v20, %v253_v25 }
 0x22e   :  { %v258_v52 = vmul.f32 %v257_v28, %v246_v26 }
 0x230   :  { %v260_v30 = vmul.f32 %v294_v27, %v258_v52 }
 0x232   :  { %v262_v31 = vadd.f32 %v295_v29, %v260_v30 }
 0x234   :  { %304 = vtanh.f32 %v262_v31 }
 0x23a   :  { %v305_v32 = vpop.eup %304 }
 0x23b   :  { %264 = vst [vmem:[#allocation5] sm:$0xff] %v305_v32 }
 0x23c   :  { %275 = dma.vmem_to_hbm [thread:$0]  %s271_s11, 128, %s273_s14, [#allocation4]  }
 0x23d   :  { %356 = dma.done.wait [#allocation4], 128  }
 0x23e   :  { %357 = vsyncadd [#allocation4], 4294967168 }
 0x23f   :  { %280 = vsyncpa [#allocation3], 1 }
 0x240   :  { %281 = vsyncpa [#allocation4], 1 }

</bundles_post_ra>
